<compile_context>
chip_gen: v7x
topology: tpu7x:2x2x1
jax: 0.10.0
libtpu: 0.0.40
codegen_flags: <defaults>
</compile_context>

<pallas_src>
import functools

import jax
import jax.numpy as jnp
from jax.experimental import pallas as pl
from jax.experimental.pallas import tpu as pltpu

_LANE = 128
_MXU_TILE = 256   # v6e/v7x MXU passes are 256 wide; prefer 256-multiple k tiles
_SUBLANE = 16     # row-tile granularity safe for both f32 (8) and bf16 (16)


def _round_up(x, m):
    return (x + m - 1) // m * m


def _vmem_capacity_bytes():
    """Per-TensorCore physical VMEM, queried at trace time."""
    try:
        return int(pltpu.get_tpu_info().vmem_capacity_bytes)
    except Exception:
        return 64 << 20   # conservative fallback (v7x per-core VMEM)


def _ffn_fused_kernel(x_ref, w1_ref, b1_ref, w2_ref, b2_ref, o_ref):
    """Whole FFN for one row tile; weights fully resident in VMEM.

    x_ref : (tm, n_hidden)       w1_ref: (n_hidden, n_forward)
    b1_ref: (1, n_forward)       w2_ref: (n_forward, n_hidden)
    b2_ref: (1, n_hidden)        o_ref : (tm, n_hidden)
    """
    h = jnp.dot(x_ref[...], w1_ref[...], preferred_element_type=jnp.float32)
    h = jnp.maximum(h + b1_ref[...], 0.0)
    # TODO(synk): nn.Dropout is identity in eval mode; training-mode dropout
    # would need pltpu.prng_seed / pltpu.prng_random_bits masking here.
    y = jnp.dot(h.astype(w2_ref.dtype), w2_ref[...],
                preferred_element_type=jnp.float32)
    o_ref[...] = (y + b2_ref[...]).astype(o_ref.dtype)


def _ffn_ktiled_kernel(x_ref, w1_ref, b1_ref, w2_ref, b2_ref, o_ref, acc_ref):
    """FFN with n_forward tiled over grid axis 1 (fc2 reduction axis).

    w1_ref: (n_hidden, tf)   b1_ref: (1, tf)   w2_ref: (tf, n_hidden)
    acc_ref: (tm, n_hidden) f32 scratch accumulator.
    """
    k = pl.program_id(1)

    @pl.when(k == 0)
    def _():
        acc_ref[...] = jnp.zeros_like(acc_ref)

    h = jnp.dot(x_ref[...], w1_ref[...], preferred_element_type=jnp.float32)
    h = jnp.maximum(h + b1_ref[...], 0.0)
    # TODO(synk): dropout (identity in eval mode) omitted between relu and fc2.
    acc_ref[...] += jnp.dot(h.astype(w2_ref.dtype), w2_ref[...],
                            preferred_element_type=jnp.float32)

    @pl.when(k == pl.num_programs(1) - 1)
    def _():
        o_ref[...] = (acc_ref[...] + b2_ref[...]).astype(o_ref.dtype)


@functools.partial(
    jax.jit, static_argnames=("tm", "compute_dtype", "vmem_ceiling_bytes"))
def position_wide_forward(x, w1, b1, w2, b2, *, tm=None,
                          compute_dtype=jnp.bfloat16,
                          vmem_ceiling_bytes=None):
    """x: (batch, seq, n_hidden) -> (batch, seq, n_hidden).

    compute_dtype: matmul input dtype (bf16 by default: near-peak MXU, half the
    DMA bytes).  Accumulation is always f32; output keeps the input's dtype.
    vmem_ceiling_bytes: optional override of the VMEM planning ceiling (used
    for testing / tuning; defaults to ~82% of the physical per-core VMEM).
    """
    orig_dtype = x.dtype
    if compute_dtype is not None:
        x = x.astype(compute_dtype)
        w1 = w1.astype(compute_dtype)
        b1 = b1.astype(compute_dtype)
        w2 = w2.astype(compute_dtype)
        b2 = b2.astype(compute_dtype)

    batch, seq, n_hidden = x.shape
    n_forward = w1.shape[1]
    out_dtype = orig_dtype

    m = batch * seq
    n_hidden_p = _round_up(n_hidden, _LANE)
    n_forward_128 = _round_up(n_forward, _LANE)

    x_itemsize = jnp.dtype(x.dtype).itemsize
    w_itemsize = jnp.dtype(w1.dtype).itemsize
    o_itemsize = jnp.dtype(out_dtype).itemsize

    # --- per-generation VMEM plan (v5e/v6e: 128 MiB, v7x: 64 MiB per core) ---
    vmem_cap = _vmem_capacity_bytes()
    hw_ceiling = min(int(0.82 * vmem_cap), vmem_cap - (8 << 20))
    ceiling = hw_ceiling if vmem_ceiling_bytes is None else int(vmem_ceiling_bytes)

    def fused_need(tm_):
        return (2 * tm_ * n_hidden_p * (x_itemsize + o_itemsize)      # x/out dbl buf
                + 2 * n_hidden_p * n_forward_128 * w_itemsize          # W1+W2 (x1, resident)
                + 8 * (n_forward_128 + n_hidden_p) * w_itemsize        # biases (sublane pad)
                + tm_ * n_forward_128 * (4 + w_itemsize))              # live h f32 + cast

    def ktiled_need(tm_, tf_):
        return (2 * tm_ * n_hidden_p * (x_itemsize + o_itemsize)      # x/out dbl buf
                + tm_ * n_hidden_p * 4                                  # f32 accumulator
                + 4 * n_hidden_p * tf_ * w_itemsize                     # W1+W2 tiles, dbl buf
                + 16 * tf_ * w_itemsize + 8 * n_hidden_p * w_itemsize   # biases
                + tm_ * tf_ * (4 + w_itemsize))                          # live h f32 + cast

    # --- path + tile selection -------------------------------------------------
    tm_fused = 256 if tm is None else tm
    tm_fused = max(_SUBLANE, min(tm_fused, _round_up(m, _SUBLANE)))

    fused = fused_need(tm_fused) <= ceiling

    if fused:
        tm_sel = tm_fused
        tf = n_forward_128
        n_forward_p = n_forward_128
        f_steps = 1
        need = fused_need(tm_sel)
    else:
        # Row tile big enough to beat the weight-streaming roofline
        # (~240 / ~650 / ~320 flops per weight byte on v5e / v6e / v7x).
        if tm is None:
            tm_k = 768 if vmem_cap >= (96 << 20) else 512
        else:
            tm_k = tm
        tm_k = max(_SUBLANE, min(tm_k, _round_up(m, _SUBLANE)))
        while True:
            fixed = ktiled_need(tm_k, 0)
            per_tf = max((ktiled_need(tm_k, _LANE) - fixed) // _LANE, 1)
            avail = ceiling - fixed
            if avail >= per_tf * _LANE or tm_k <= 256:
                break
            tm_k = max(256, tm_k // 2)
        tf_cap = max(_LANE, avail // per_tf) if avail > 0 else _LANE
        # Largest tf that fits (fewest k steps -> least accumulator RMW traffic),
        # in 256 multiples for the 256-wide MXUs; 128 floor.
        if tf_cap >= _MXU_TILE:
            tf = (tf_cap // _MXU_TILE) * _MXU_TILE
            tf = min(tf, _round_up(n_forward_128, _MXU_TILE))
        else:
            tf = _LANE
        tm_sel = tm_k
        n_forward_p = _round_up(n_forward_128, tf)
        f_steps = n_forward_p // tf
        need = ktiled_need(tm_sel, tf)

    m_p = _round_up(m, tm_sel)
    grid_rows = m_p // tm_sel

    # --- pad with zeros (skipped when already aligned; padding is exact) ------
    x2 = x.reshape(m, n_hidden)
    if (m_p, n_hidden_p) != (m, n_hidden):
        x2 = jnp.pad(x2, ((0, m_p - m), (0, n_hidden_p - n_hidden)))
    # TODO(synk): weights are static per layer; in a full model, pre-pad them
    # once outside the per-call hot path instead of re-padding under jit.
    if (n_hidden_p, n_forward_p) != (n_hidden, n_forward):
        w1 = jnp.pad(w1, ((0, n_hidden_p - n_hidden), (0, n_forward_p - n_forward)))
        w2 = jnp.pad(w2, ((0, n_forward_p - n_forward), (0, n_hidden_p - n_hidden)))
    if n_forward_p != n_forward:
        b1 = jnp.pad(b1, (0, n_forward_p - n_forward))
    if n_hidden_p != n_hidden:
        b2 = jnp.pad(b2, (0, n_hidden_p - n_hidden))
    b1_2d = b1.reshape(1, n_forward_p)
    b2_2d = b2.reshape(1, n_hidden_p)

    # --- compiler VMEM limit: cover the plan, stay below ~88% of physical -----
    vmem_limit = int(1.3 * need) + (4 << 20)
    vmem_limit = max(vmem_limit, 24 << 20)
    vmem_limit = min(vmem_limit, int(0.88 * vmem_cap))
    vmem_limit = max(vmem_limit, int(need) + (2 << 20))

    # --- cost estimate (k-tiled path re-streams weights once per row tile) ----
    flops = 4 * m * n_hidden * n_forward
    weight_bytes = (2 * n_hidden_p * n_forward_p + n_forward_p + n_hidden_p) * w_itemsize
    w_streams = 1 if fused else grid_rows
    bytes_accessed = (m_p * n_hidden_p * (x_itemsize + o_itemsize)
                      + w_streams * weight_bytes)
    cost = pl.CostEstimate(flops=flops, transcendentals=0,
                           bytes_accessed=bytes_accessed)

    def _single_buffered(shape, index_map):
        # Grid-invariant operands: one VMEM buffer instead of the default two.
        return pl.BlockSpec(shape, index_map, pipeline_mode=pl.Buffered(1))

    if fused:
        kernel = _ffn_fused_kernel
        grid = (grid_rows,)
        in_specs = [
            pl.BlockSpec((tm_sel, n_hidden_p), lambda i: (i, 0)),
            _single_buffered((n_hidden_p, tf), lambda i: (0, 0)),
            _single_buffered((1, tf), lambda i: (0, 0)),
            _single_buffered((tf, n_hidden_p), lambda i: (0, 0)),
            _single_buffered((1, n_hidden_p), lambda i: (0, 0)),
        ]
        out_spec = pl.BlockSpec((tm_sel, n_hidden_p), lambda i: (i, 0))
        scratch = []
        dim_sem = ("parallel",)
    else:
        kernel = _ffn_ktiled_kernel
        grid = (grid_rows, f_steps)
        in_specs = [
            pl.BlockSpec((tm_sel, n_hidden_p), lambda i, k: (i, 0)),
            pl.BlockSpec((n_hidden_p, tf), lambda i, k: (0, k)),
            pl.BlockSpec((1, tf), lambda i, k: (0, k)),
            pl.BlockSpec((tf, n_hidden_p), lambda i, k: (k, 0)),
            _single_buffered((1, n_hidden_p), lambda i, k: (0, 0)),
        ]
        out_spec = pl.BlockSpec((tm_sel, n_hidden_p), lambda i, k: (i, 0))
        scratch = [pltpu.VMEM((tm_sel, n_hidden_p), jnp.float32)]
        dim_sem = ("parallel", "arbitrary")

    out = pl.pallas_call(
        kernel,
        out_shape=jax.ShapeDtypeStruct((m_p, n_hidden_p), out_dtype),
        grid_spec=pltpu.PrefetchScalarGridSpec(
            num_scalar_prefetch=0,
            grid=grid,
            in_specs=in_specs,
            out_specs=out_spec,
            scratch_shapes=scratch,
        ),
        compiler_params=pltpu.CompilerParams(
            dimension_semantics=dim_sem,
            vmem_limit_bytes=vmem_limit,
        ),
        cost_estimate=cost,
    )(x2, w1, b1_2d, w2, b2_2d)

    if (m_p, n_hidden_p) != (m, n_hidden):
        out = out[:m, :n_hidden]
    return out.reshape(batch, seq, n_hidden)


def _reference(x, w1, b1, w2, b2):
    h = jnp.maximum(jnp.einsum("bsh,hf->bsf", x, w1) + b1, 0.0)
    return jnp.einsum("bsf,fh->bsh", h, w2) + b2


def _make_inputs(key, batch, seq, n_hidden, n_forward):
    kx, k1, kb1, k2, kb2 = jax.random.split(key, 5)
    x = jax.random.normal(kx, (batch, seq, n_hidden), dtype=jnp.float32)
    w1 = jax.random.normal(k1, (n_hidden, n_forward), dtype=jnp.float32) * 0.1
    b1 = jax.random.normal(kb1, (n_forward,), dtype=jnp.float32) * 0.1
    w2 = jax.random.normal(k2, (n_forward, n_hidden), dtype=jnp.float32) * 0.1
    b2 = jax.random.normal(kb2, (n_hidden,), dtype=jnp.float32) * 0.1
    return x, w1, b1, w2, b2


if __name__ == "__main__":
    key = jax.random.PRNGKey(0)
    k_a, k_b = jax.random.split(key)

    # 1) Strict numeric check: f32 compute on the fused, weight-resident path.
    x, w1, b1, w2, b2 = _make_inputs(k_a, batch=2, seq=8, n_hidden=32, n_forward=64)
    ref = _reference(x, w1, b1, w2, b2)
    out = jax.block_until_ready(
        position_wide_forward(x, w1, b1, w2, b2, compute_dtype=jnp.float32))
    assert out.shape == x.shape and out.dtype == x.dtype
    assert jnp.allclose(out, ref, atol=1e-4, rtol=1e-4), "mismatch (fused f32 path)"

    # 2) Default mixed precision: bf16 matmuls with f32 accumulation (fused path).
    out = jax.block_until_ready(position_wide_forward(x, w1, b1, w2, b2))
    assert out.shape == x.shape and out.dtype == x.dtype
    assert jnp.allclose(out, ref, atol=1e-1, rtol=5e-2), "mismatch (fused bf16 path)"

    # 3) Force the n_forward-tiled accumulator path via a tiny planning ceiling
    #    (as used when the weight pair cannot stay resident in VMEM).
    x, w1, b1, w2, b2 = _make_inputs(k_b, batch=2, seq=8, n_hidden=32, n_forward=512)
    ref = _reference(x, w1, b1, w2, b2)
    out = jax.block_until_ready(
        position_wide_forward(x, w1, b1, w2, b2, vmem_ceiling_bytes=256 * 1024))
    assert out.shape == x.shape and out.dtype == x.dtype
    assert jnp.allclose(out, ref, atol=1e-1, rtol=5e-2), "mismatch (k-tiled bf16 path)"

    print("KERNEL_OK")
</pallas_src>

<mosaic_0001>
module attributes {stable_mosaic.version = 11 : i64} {
  func.func @_ffn_fused_kernel(%arg0: i32, %arg1: memref<16x128xf32, #tpu.memory_space<vmem>>, %arg2: memref<128x128xf32, #tpu.memory_space<vmem>>, %arg3: memref<1x128xf32, #tpu.memory_space<vmem>>, %arg4: memref<128x128xf32, #tpu.memory_space<vmem>>, %arg5: memref<1x128xf32, #tpu.memory_space<vmem>>, %arg6: memref<16x128xf32, #tpu.memory_space<vmem>>) attributes {dimension_semantics = [#tpu.dimension_semantics<parallel>], iteration_bounds = array<i64: 1>, scalar_prefetch = 0 : i64, scratch_operands = 0 : i64, tpu.core_type = #tpu.core_type<tc>, window_params = [{transform_indices = @transform_0, window_bounds = array<i64: 16, 128>}, {pipeline_mode = #tpu.pipeline_mode<synchronous>, transform_indices = @transform_1, window_bounds = array<i64: 128, 128>}, {pipeline_mode = #tpu.pipeline_mode<synchronous>, transform_indices = @transform_2, window_bounds = array<i64: 1, 128>}, {pipeline_mode = #tpu.pipeline_mode<synchronous>, transform_indices = @transform_3, window_bounds = array<i64: 128, 128>}, {pipeline_mode = #tpu.pipeline_mode<synchronous>, transform_indices = @transform_4, window_bounds = array<i64: 1, 128>}, {transform_indices = @transform_5, window_bounds = array<i64: 16, 128>}]} {
    %c0 = arith.constant 0 : index
    %c0_0 = arith.constant 0 : index
    %0 = vector.load %arg1[%c0, %c0_0] : memref<16x128xf32, #tpu.memory_space<vmem>>, vector<16x128xf32>
    %c0_1 = arith.constant 0 : index
    %c0_2 = arith.constant 0 : index
    %1 = vector.load %arg2[%c0_1, %c0_2] : memref<128x128xf32, #tpu.memory_space<vmem>>, vector<128x128xf32>
    %cst = arith.constant dense<0.000000e+00> : vector<16x128xf32>
    %2 = tpu.matmul %0, %1, %cst {dimension_numbers = #tpu.dot_dimension_numbers<[1], [0], [0], [1], [0, 0, 1, 1], [], []>} : vector<16x128xf32>, vector<128x128xf32>, vector<16x128xf32> -> vector<16x128xf32>
    %c0_3 = arith.constant 0 : index
    %c0_4 = arith.constant 0 : index
    %3 = vector.load %arg3[%c0_3, %c0_4] : memref<1x128xf32, #tpu.memory_space<vmem>>, vector<1x128xf32>
    %4 = vector.broadcast %3 : vector<1x128xf32> to vector<16x128xf32>
    %5 = arith.addf %2, %4 : vector<16x128xf32>
    %cst_5 = arith.constant 0.000000e+00 : f32
    %6 = vector.broadcast %cst_5 : f32 to vector<16x128xf32>
    %7 = arith.maximumf %5, %6 : vector<16x128xf32>
    %c0_6 = arith.constant 0 : index
    %c0_7 = arith.constant 0 : index
    %8 = vector.load %arg4[%c0_6, %c0_7] : memref<128x128xf32, #tpu.memory_space<vmem>>, vector<128x128xf32>
    %cst_8 = arith.constant dense<0.000000e+00> : vector<16x128xf32>
    %9 = tpu.matmul %7, %8, %cst_8 {dimension_numbers = #tpu.dot_dimension_numbers<[1], [0], [0], [1], [0, 0, 1, 1], [], []>} : vector<16x128xf32>, vector<128x128xf32>, vector<16x128xf32> -> vector<16x128xf32>
    %c0_9 = arith.constant 0 : index
    %c0_10 = arith.constant 0 : index
    %10 = vector.load %arg5[%c0_9, %c0_10] : memref<1x128xf32, #tpu.memory_space<vmem>>, vector<1x128xf32>
    %11 = vector.broadcast %10 : vector<1x128xf32> to vector<16x128xf32>
    %12 = arith.addf %9, %11 : vector<16x128xf32>
    %c0_11 = arith.constant 0 : index
    %c0_12 = arith.constant 0 : index
    %13 = vector.load %arg6[%c0_11, %c0_12] : memref<16x128xf32, #tpu.memory_space<vmem>>, vector<16x128xf32>
    tpu.vector_store %arg6[%c0_11, %c0_12], %12 {strides = array<i32>} : memref<16x128xf32, #tpu.memory_space<vmem>>, vector<16x128xf32>,
    return
  }
  func.func @transform_0(%arg0: i32) -> (i32, i32) {
    %c0_i32 = arith.constant 0 : i32
    %c0_i32_0 = arith.constant 0 : i32
    return %arg0, %c0_i32 : i32, i32
  }
  func.func @transform_1(%arg0: i32) -> (i32, i32) {
    %c0_i32 = arith.constant 0 : i32
    %c0_i32_0 = arith.constant 0 : i32
    %c0_i32_1 = arith.constant 0 : i32
    return %c0_i32, %c0_i32_0 : i32, i32
  }
  func.func @transform_2(%arg0: i32) -> (i32, i32) {
    %c0_i32 = arith.constant 0 : i32
    %c0_i32_0 = arith.constant 0 : i32
    %c0_i32_1 = arith.constant 0 : i32
    return %c0_i32, %c0_i32_0 : i32, i32
  }
  func.func @transform_3(%arg0: i32) -> (i32, i32) {
    %c0_i32 = arith.constant 0 : i32
    %c0_i32_0 = arith.constant 0 : i32
    %c0_i32_1 = arith.constant 0 : i32
    return %c0_i32, %c0_i32_0 : i32, i32
  }
  func.func @transform_4(%arg0: i32) -> (i32, i32) {
    %c0_i32 = arith.constant 0 : i32
    %c0_i32_0 = arith.constant 0 : i32
    %c0_i32_1 = arith.constant 0 : i32
    return %c0_i32, %c0_i32_0 : i32, i32
  }
  func.func @transform_5(%arg0: i32) -> (i32, i32) {
    %c0_i32 = arith.constant 0 : i32
    %c0_i32_0 = arith.constant 0 : i32
    return %arg0, %c0_i32 : i32, i32
  }
}

</mosaic_0001>

<bundles_post_ra>
// kernel: position_wide_forward.1
= control target key start
LH: loop header
LB: loop body
LE: loop exit
PB: predicated region body
PF: predicated region fallthrough
CT: control target
= control target key end

     0   :  { %s542_s1 = inlined_call_operand.vmem [shape: f32[128,128], index: 1, kind: input, shape index: {}]   ;;  %s543_s0 = inlined_call_operand.vmem [shape: f32[16,128], index: 0, kind: input, shape index: {}]   ;;  %s544_s3 = inlined_call_operand.vmem [shape: f32[128,128], index: 3, kind: input, shape index: {}]   ;;  %s545_s2 = inlined_call_operand.vmem [shape: f32[1,128], index: 2, kind: input, shape index: {}]   ;;  %s546_s4 = inlined_call_operand.vmem [shape: f32[1,128], index: 4, kind: input, shape index: {}]   ;;  %s547_s5 = inlined_call_operand.vmem [shape: f32[16,128], index: 5, kind: output, shape index: {}]  }
   0x1   :  { %v22_v0 = vld [vmem:[%s542_s1] sm:$0xff]  ;;  %v23_v1 = vld [vmem:[%s542_s1 + $0x8] sm:$0xff]  ;;  %v24_v2 = vld [vmem:[%s542_s1 + $0x10] sm:$0xff] }
   0x2   :  { %v334_v3 = vpack.c.bf16 %v23_v1, %v22_v0  ;;  %v25_v4 = vld [vmem:[%s542_s1 + $0x18] sm:$0xff]  ;;  %v26_v6 = vld [vmem:[%s542_s1 + $0x20] sm:$0xff]  ;;  %v27_v7 = vld [vmem:[%s542_s1 + $0x28] sm:$0xff] }
   0x3   :  { %v338_v5 = vpack.c.bf16 %v25_v4, %v24_v2  ;;  %v342_v8 = vpack.c.bf16 %v27_v7, %v26_v6  ;;  %v28_v9 = vld [vmem:[%s542_s1 + $0x30] sm:$0xff]  ;;  %v29_v10 = vld [vmem:[%s542_s1 + $0x38] sm:$0xff]  ;;  %v20_v11 = vld [vmem:[%s543_s0] sm:$0xff] }
   0x4   :  { %335 = vmatprep.subr.bf16.mxu0 %v334_v3  ;;  %296 = vmatprep.mubr.f32.mxu0 %v20_v11  ;;  %v122_v12 = vld [vmem:[%s544_s3] sm:$0xff]  ;;  %v123_v13 = vld [vmem:[%s544_s3 + $0x8] sm:$0xff]  ;;  %v124_v14 = vld [vmem:[%s544_s3 + $0x10] sm:$0xff]  ;;  %v346_v20 = vpack.c.bf16 %v29_v10, %v28_v9 }
   0x5   :  { %337 = vmatpush3.bf16.msra.mxu0 %v334_v3  ;;  %v366_v15 = vpack.c.bf16 %v123_v13, %v122_v12  ;;  %v125_v16 = vld [vmem:[%s544_s3 + $0x18] sm:$0xff]  ;;  %v126_v18 = vld [vmem:[%s544_s3 + $0x20] sm:$0xff]  ;;  %v127_v19 = vld [vmem:[%s544_s3 + $0x28] sm:$0xff] }
   0x6   :  { %339 = vmatprep.subr.bf16.mxu0 %v338_v5  ;;  %v370_v17 = vpack.c.bf16 %v125_v16, %v124_v14  ;;  %v30_v21 = vld [vmem:[%s542_s1 + $0x40] sm:$0xff]  ;;  %v31_v22 = vld [vmem:[%s542_s1 + $0x48] sm:$0xff]  ;;  %v374_v23 = vpack.c.bf16 %v127_v19, %v126_v18  ;;  %v128_v24 = vld [vmem:[%s544_s3 + $0x30] sm:$0xff] }
   0x7   :  { %367 = vmatprep.subr.bf16.mxu1 %v366_v15  ;;  %v129_v25 = vld [vmem:[%s544_s3 + $0x38] sm:$0xff]  ;;  %v350_v26 = vpack.c.bf16 %v31_v22, %v30_v21  ;;  %v32_v27 = vld [vmem:[%s542_s1 + $0x50] sm:$0xff]  ;;  %v130_v30 = vld [vmem:[%s544_s3 + $0x40] sm:$0xff] }
   0x8   :  { %369 = vmatpush3.bf16.msra.mxu1 %v366_v15  ;;  %v33_v28 = vld [vmem:[%s542_s1 + $0x58] sm:$0xff]  ;;  %v378_v29 = vpack.c.bf16 %v129_v25, %v128_v24  ;;  %v131_v31 = vld [vmem:[%s544_s3 + $0x48] sm:$0xff]  ;;  %v34_v33 = vld [vmem:[%s542_s1 + $0x60] sm:$0xff] }
   0x9   :  { %341 = vmatpush3.bf16.msra.mxu0 %v338_v5  ;;  %371 = vmatprep.subr.bf16.mxu1 %v370_v17  ;;  %v354_v32 = vpack.c.bf16 %v33_v28, %v32_v27  ;;  %v35_v34 = vld [vmem:[%s542_s1 + $0x68] sm:$0xff]  ;;  %v382_v35 = vpack.c.bf16 %v131_v31, %v130_v30  ;;  %v132_v36 = vld [vmem:[%s544_s3 + $0x50] sm:$0xff]  ;;  %v133_v37 = vld [vmem:[%s544_s3 + $0x58] sm:$0xff] }
   0xa   :  { %343 = vmatprep.subr.bf16.mxu0 %v342_v8  ;;  %v358_v38 = vpack.c.bf16 %v35_v34, %v34_v33  ;;  %v36_v39 = vld [vmem:[%s542_s1 + $0x70] sm:$0xff]  ;;  %v37_v40 = vld [vmem:[%s542_s1 + $0x78] sm:$0xff]  ;;  %v386_v41 = vpack.c.bf16 %v133_v37, %v132_v36  ;;  %v134_v42 = vld [vmem:[%s544_s3 + $0x60] sm:$0xff] }
   0xb   :  { %v135_v43 = vld [vmem:[%s544_s3 + $0x68] sm:$0xff]  ;;  %v362_v44 = vpack.c.bf16 %v37_v40, %v36_v39  ;;  %v136_v47 = vld [vmem:[%s544_s3 + $0x70] sm:$0xff]  ;;  %v137_v48 = vld [vmem:[%s544_s3 + $0x78] sm:$0xff] }
   0xc   :  { %373 = vmatpush3.bf16.msra.mxu1 %v370_v17  ;;  %v390_v45 = vpack.c.bf16 %v135_v43, %v134_v42  ;;  %v21_v46 = vld [vmem:[%s543_s0 + $0x8] sm:$0xff]  ;;  %v394_v49 = vpack.c.bf16 %v137_v48, %v136_v47  ;;  %v226_v50 = vld [vmem:[%s545_s2] ss:$0 sm:$0xff] }
   0xd   :  { %345 = vmatpush3.bf16.msra.mxu0 %v342_v8  ;;  %375 = vmatprep.subr.bf16.mxu1 %v374_v23  ;;  %v227_v57 = vld [vmem:[%s546_s4] ss:$0 sm:$0xff] }
   0xe   :  { %347 = vmatprep.subr.bf16.mxu0 %v346_v20 }
  0x10   :  { %377 = vmatpush3.bf16.msra.mxu1 %v374_v23 }
  0x11   :  { %349 = vmatpush3.bf16.msra.mxu0 %v346_v20  ;;  %379 = vmatprep.subr.bf16.mxu1 %v378_v29 }
  0x12   :  { %351 = vmatprep.subr.bf16.mxu0 %v350_v26 }
  0x14   :  { %381 = vmatpush3.bf16.msra.mxu1 %v378_v29 }
  0x15   :  { %353 = vmatpush3.bf16.msra.mxu0 %v350_v26  ;;  %383 = vmatprep.subr.bf16.mxu1 %v382_v35 }
  0x16   :  { %355 = vmatprep.subr.bf16.mxu0 %v354_v32 }
  0x18   :  { %385 = vmatpush3.bf16.msra.mxu1 %v382_v35 }
  0x19   :  { %357 = vmatpush3.bf16.msra.mxu0 %v354_v32  ;;  %387 = vmatprep.subr.bf16.mxu1 %v386_v41 }
  0x1a   :  { %359 = vmatprep.subr.bf16.mxu0 %v358_v38 }
  0x1c   :  { %389 = vmatpush3.bf16.msra.mxu1 %v386_v41 }
  0x1d   :  { %361 = vmatpush3.bf16.msra.mxu0 %v358_v38  ;;  %391 = vmatprep.subr.bf16.mxu1 %v390_v45 }
  0x1e   :  { %363 = vmatprep.subr.bf16.mxu0 %v362_v44 }
  0x20   :  { %393 = vmatpush3.bf16.msra.mxu1 %v390_v45 }
  0x21   :  { %365 = vmatpush3.bf16.msra.mxu0 %v362_v44  ;;  %395 = vmatprep.subr.bf16.mxu1 %v394_v49 }
  0x24   :  { %297 = vmatmul.mubr.f32.vlgmr.msra.gmra.mrb[0].mxu0 %v21_v46  ;;  %397 = vmatpush3.bf16.msra.mxu1 %v394_v49 }
  0xf7   :  { %v298_v51 = vpop.f32.mrb[0].mxu0 }
  0xf8   :  { %v117_v52 = vadd.f32 %v298_v51, %v226_v50  ;;  %v111_v53 = vpop.f32.mrb[1].mxu0 }
  0xf9   :  { %v112_v54 = vadd.f32 %v226_v50, %v111_v53 }
  0xfa   :  { %v121_v56 = vmax.f32 %v117_v52, 0.0 }
  0xfb   :  { %v120_v55 = vmax.f32 %v112_v54, 0.0 }
  0xfd   :  { %331 = vmatprep.mubr.f32.mxu1 %v120_v55 }
  0xfe   :  { %332 = vmatmul.mubr.f32.vlgmr.msra.gmra.mrb[0].mxu1 %v121_v56 }
 0x1d1   :  { %v333_v58 = vpop.f32.mrb[0].mxu1 }
 0x1d2   :  { %v217_v59 = vadd.f32 %v333_v58, %v227_v57  ;;  %v211_v60 = vpop.f32.mrb[1].mxu1 }
 0x1d3   :  { %v212_v61 = vadd.f32 %v227_v57, %v211_v60 }
 0x1d4   :  { %221 = vst [vmem:[%s547_s5 + $0x8] sm:$0xff] %v217_v59 }
 0x1d5   :  { %220 = vst [vmem:[%s547_s5] sm:$0xff] %v212_v61 }

</bundles_post_ra>
